<compile_context>
chip_gen: v5e
topology: v5e:2x2
jax: 0.10.0
libtpu: 0.0.40
codegen_flags: <defaults>
</compile_context>

<pallas_src>
import jax
import jax.numpy as jnp
from jax.experimental import pallas as pl
from jax.experimental.pallas import tpu as pltpu

LANES = 128


def _tpu_defaults():
    """Return (num_splits, row_tile_max) tuned for the local TPU generation."""
    try:
        kind = jax.devices()[0].device_kind.lower()
    except Exception:
        kind = ""
    if ("v5e" in kind) or ("v5 lite" in kind) or ("v5lite" in kind):
        return 1, 2048          # single TC, ~0.82 TB/s: 1 MiB f32 tiles suffice
    if ("v6e" in kind) or ("v6 lite" in kind) or ("v6lite" in kind):
        return 1, 4096          # single TC, ~1.4 TB/s: 2 MiB f32 tiles
    # v7x / v4 / v5p (2 TensorCores per device) and unknown chips.
    return 2, 8192              # 2-way core split, 4 MiB f32 tiles


def _partial_sumsq(x2d, y2d, rows, row_tile, num_splits, steps, num_blocks):
    """Kernel launch: returns sum((x2d - y2d)^2) over the first `rows` rows."""
    # Masking is only needed if the last real block is partial, or if the
    # rectangular (splits x steps) grid has overflow (duplicate) blocks.
    needs_mask = (rows % row_tile != 0) or (num_splits * steps != num_blocks)

    def kernel(x_ref, y_ref, o_ref, acc_ref):
        i = pl.program_id(1)

        @pl.when(i == 0)
        def _():
            acc_ref[...] = jnp.zeros_like(acc_ref)

        d = x_ref[...].astype(jnp.float32) - y_ref[...].astype(jnp.float32)
        sq = d * d
        if needs_mask:
            s = pl.program_id(0)
            row0 = (s * steps + i) * row_tile          # logical (unclamped) row
            row_ids = jax.lax.broadcasted_iota(jnp.int32, (row_tile, LANES), 0)
            sq = jnp.where(row_ids < (rows - row0), sq, 0.0)
        acc_ref[...] += sq

        @pl.when(i == steps - 1)
        def _():
            # One cross-sublane reduce per split (XLU slot is idle here);
            # output is a tiny (1, 1, 128) slab instead of the full tile.
            o_ref[...] = jnp.sum(acc_ref[...], axis=0, keepdims=True)[None]

    def blk_index(s, i):
        # Clamp overflow blocks of the rectangular grid back in bounds; their
        # contribution is zeroed by the mask above.
        return (jnp.minimum(s * steps + i, num_blocks - 1), 0)

    # Exact VMEM budget: 2-deep pipeline on both inputs + accumulator scratch
    # + allowance for elementwise temporaries, ~20% headroom, small slack.
    block_f32_bytes = row_tile * LANES * 4
    in_tile_bytes = row_tile * LANES * (x2d.dtype.itemsize + y2d.dtype.itemsize)
    vmem_needed = 2 * in_tile_bytes + block_f32_bytes + 2 * block_f32_bytes
    vmem_limit = int(min(48 << 20, vmem_needed + (vmem_needed // 5) + (2 << 20)))

    partial = pl.pallas_call(
        kernel,
        out_shape=jax.ShapeDtypeStruct((num_splits, 1, LANES), jnp.float32),
        grid_spec=pltpu.PrefetchScalarGridSpec(
            num_scalar_prefetch=0,
            grid=(num_splits, steps),
            in_specs=[
                pl.BlockSpec((row_tile, LANES), blk_index),
                pl.BlockSpec((row_tile, LANES), blk_index),
            ],
            out_specs=pl.BlockSpec((1, 1, LANES), lambda s, i: (s, 0, 0)),
            scratch_shapes=[pltpu.VMEM((row_tile, LANES), jnp.float32)],
        ),
        compiler_params=pltpu.CompilerParams(
            dimension_semantics=("parallel", "arbitrary"),
            vmem_limit_bytes=vmem_limit,
        ),
    )(x2d, y2d)
    return jnp.sum(partial, dtype=jnp.float32)


def rmse_loss(x, y, *, _row_tile_max=None, _num_splits=None):
    """sqrt(mean((x - y)^2)) computed with a Pallas TPU kernel. Returns f32 scalar."""
    assert x.shape == y.shape, "x and y must have identical shapes"
    n_total = int(x.size)
    assert n_total > 0, "empty input"

    # TODO(synk): float64 inputs are accumulated in float32 (TPU-native),
    # matching the torch module under its default float32 execution.
    x_flat = x.reshape(-1)      # free bitcast for default row-major layouts
    y_flat = y.reshape(-1)

    num_splits, row_tile_max = _tpu_defaults()
    if _row_tile_max is not None:
        row_tile_max = _row_tile_max

    rows = n_total // LANES
    rem = n_total % LANES

    # <128-element ragged tail (only when numel isn't a multiple of 128) is
    # folded in with plain JAX; everything else streams through the kernel.
    tail_sumsq = jnp.float32(0.0)
    if rem:
        xt = x_flat[rows * LANES:].astype(jnp.float32)
        yt = y_flat[rows * LANES:].astype(jnp.float32)
        tail_sumsq = jnp.sum((xt - yt) * (xt - yt), dtype=jnp.float32)

    if rows == 0:
        total = tail_sumsq
    else:
        if rem:
            # Non-128-multiple sizes: lane-aligned prefix (XLA may materialize
            # this slice; the aligned common case below is zero-copy).
            x_main = x_flat[: rows * LANES]
            y_main = y_flat[: rows * LANES]
        else:
            x_main = x_flat
            y_main = y_flat
        x2d = x_main.reshape(rows, LANES)
        y2d = y_main.reshape(rows, LANES)

        if rows <= row_tile_max:
            row_tile = rows          # single full-extent block, no masking
        else:
            row_tile = row_tile_max  # multiple of 8 (and 32) by construction
        num_blocks = pl.cdiv(rows, row_tile)

        if _num_splits is not None:
            num_splits_eff = max(1, min(int(_num_splits), num_blocks))
        elif num_blocks < 4:
            num_splits_eff = 1       # splitting tiny grids is pure overhead
        else:
            num_splits_eff = min(num_splits, num_blocks)
        steps = pl.cdiv(num_blocks, num_splits_eff)

        total = _partial_sumsq(x2d, y2d, rows, row_tile,
                               num_splits_eff, steps, num_blocks) + tail_sumsq

    return jnp.sqrt(total / jnp.float32(n_total))


if __name__ == "__main__":
    key = jax.random.PRNGKey(0)
    kx, ky = jax.random.split(key)

    # 1) Lane-aligned NCHW-style shape (zero-copy path, single block).
    shape = (2, 4, 16, 16)
    x = jax.random.normal(kx, shape, dtype=jnp.float32)
    y = jax.random.normal(ky, shape, dtype=jnp.float32)
    loss = rmse_loss(x, y)
    jax.block_until_ready(loss)
    ref = jnp.sqrt(jnp.mean((x - y) ** 2))
    assert jnp.allclose(loss, ref, rtol=1e-6, atol=1e-6), (loss, ref)

    # 2) Non-128-multiple shape (lane-aligned prefix + plain-JAX ragged tail).
    shape2 = (3, 5, 17, 19)
    x2 = jax.random.normal(kx, shape2, dtype=jnp.float32)
    y2 = jax.random.normal(ky, shape2, dtype=jnp.float32)
    loss2 = rmse_loss(x2, y2)
    jax.block_until_ready(loss2)
    ref2 = jnp.sqrt(jnp.mean((x2 - y2) ** 2))
    assert jnp.allclose(loss2, ref2, rtol=1e-5, atol=1e-6), (loss2, ref2)

    # 3) Multi-step accumulation + partial-last-block masking + 2-way split
    #    (small forced tile so these code paths run on every chip generation).
    shape3 = (2, 4, 40, 128)          # 40960 elems -> 320 lane rows
    x3 = jax.random.normal(kx, shape3, dtype=jnp.float32)
    y3 = jax.random.normal(ky, shape3, dtype=jnp.float32)
    loss3 = rmse_loss(x3, y3, _row_tile_max=128, _num_splits=2)
    jax.block_until_ready(loss3)
    ref3 = jnp.sqrt(jnp.mean((x3 - y3) ** 2))
    assert jnp.allclose(loss3, ref3, rtol=1e-5, atol=1e-6), (loss3, ref3)

    print("KERNEL_OK")
</pallas_src>

<mosaic_0001>
module attributes {stable_mosaic.version = 11 : i64} {
  func.func @kernel(%arg0: i32, %arg1: i32, %arg2: memref<16x128xf32, #tpu.memory_space<vmem>>, %arg3: memref<16x128xf32, #tpu.memory_space<vmem>>, %arg4: memref<1x1x128xf32, #tpu.memory_space<vmem>>, %arg5: memref<16x128xf32, #tpu.memory_space<vmem>>) attributes {dimension_semantics = [#tpu.dimension_semantics<parallel>, #tpu.dimension_semantics<arbitrary>], iteration_bounds = array<i64: 1, 1>, scalar_prefetch = 0 : i64, scratch_operands = 1 : i64, tpu.core_type = #tpu.core_type<tc>, window_params = [{transform_indices = @transform_0, window_bounds = array<i64: 16, 128>}, {transform_indices = @transform_1, window_bounds = array<i64: 16, 128>}, {transform_indices = @transform_2, window_bounds = array<i64: 1, 1, 128>}]} {
    %c0_i32 = arith.constant 0 : i32
    %0 = arith.cmpi eq, %arg1, %c0_i32 : i32
    %1 = arith.extui %0 : i1 to i32
    %c0_i32_0 = arith.constant 0 : i32
    %2 = arith.cmpi ne, %1, %c0_i32_0 : i32
    scf.if %2 {
      %cst = arith.constant 0.000000e+00 : f32
      %13 = vector.broadcast %cst : f32 to vector<16x128xf32>
      %c0_10 = arith.constant 0 : index
      %c0_11 = arith.constant 0 : index
      %14 = vector.load %arg5[%c0_10, %c0_11] : memref<16x128xf32, #tpu.memory_space<vmem>>, vector<16x128xf32>
      tpu.vector_store %arg5[%c0_10, %c0_11], %13 {strides = array<i32>} : memref<16x128xf32, #tpu.memory_space<vmem>>, vector<16x128xf32>,
    } else {
    }
    %c0 = arith.constant 0 : index
    %c0_1 = arith.constant 0 : index
    %3 = vector.load %arg2[%c0, %c0_1] : memref<16x128xf32, #tpu.memory_space<vmem>>, vector<16x128xf32>
    %c0_2 = arith.constant 0 : index
    %c0_3 = arith.constant 0 : index
    %4 = vector.load %arg3[%c0_2, %c0_3] : memref<16x128xf32, #tpu.memory_space<vmem>>, vector<16x128xf32>
    %5 = arith.subf %3, %4 : vector<16x128xf32>
    %6 = arith.mulf %5, %5 : vector<16x128xf32>
    %c0_4 = arith.constant 0 : index
    %c0_5 = arith.constant 0 : index
    %7 = vector.load %arg5[%c0_4, %c0_5] : memref<16x128xf32, #tpu.memory_space<vmem>>, vector<16x128xf32>
    %8 = arith.addf %7, %6 : vector<16x128xf32>
    %c0_6 = arith.constant 0 : index
    %c0_7 = arith.constant 0 : index
    %9 = vector.load %arg5[%c0_6, %c0_7] : memref<16x128xf32, #tpu.memory_space<vmem>>, vector<16x128xf32>
    tpu.vector_store %arg5[%c0_6, %c0_7], %8 {strides = array<i32>} : memref<16x128xf32, #tpu.memory_space<vmem>>, vector<16x128xf32>,
    %c0_i32_8 = arith.constant 0 : i32
    %10 = arith.cmpi eq, %arg1, %c0_i32_8 : i32
    %11 = arith.extui %10 : i1 to i32
    %c0_i32_9 = arith.constant 0 : i32
    %12 = arith.cmpi ne, %11, %c0_i32_9 : i32
    scf.if %12 {
      %c0_10 = arith.constant 0 : index
      %c0_11 = arith.constant 0 : index
      %13 = vector.load %arg5[%c0_10, %c0_11] : memref<16x128xf32, #tpu.memory_space<vmem>>, vector<16x128xf32>
      %cst = arith.constant dense<0.000000e+00> : vector<128xf32>
      %14 = vector.multi_reduction <add>, %13, %cst [0] : vector<16x128xf32> to vector<128xf32>
      %15 = vector.shape_cast %14 : vector<128xf32> to vector<1x128xf32>
      %16 = vector.shape_cast %15 : vector<1x128xf32> to vector<1x1x128xf32>
      %c0_12 = arith.constant 0 : index
      %c0_13 = arith.constant 0 : index
      %c0_14 = arith.constant 0 : index
      %17 = vector.load %arg4[%c0_12, %c0_13, %c0_14] : memref<1x1x128xf32, #tpu.memory_space<vmem>>, vector<1x1x128xf32>
      tpu.vector_store %arg4[%c0_12, %c0_13, %c0_14], %16 {strides = array<i32>} : memref<1x1x128xf32, #tpu.memory_space<vmem>>, vector<1x1x128xf32>,
    } else {
    }
    return
  }
  func.func @transform_0(%arg0: i32, %arg1: i32) -> (i32, i32) {
    %c1_i32 = arith.constant 1 : i32
    %0 = arith.muli %arg0, %c1_i32 : i32
    %1 = arith.addi %0, %arg1 : i32
    %c0_i32 = arith.constant 0 : i32
    %2 = arith.minsi %1, %c0_i32 : i32
    %c0_i32_0 = arith.constant 0 : i32
    %c0_i32_1 = arith.constant 0 : i32
    return %2, %c0_i32_0 : i32, i32
  }
  func.func @transform_1(%arg0: i32, %arg1: i32) -> (i32, i32) {
    %c1_i32 = arith.constant 1 : i32
    %0 = arith.muli %arg0, %c1_i32 : i32
    %1 = arith.addi %0, %arg1 : i32
    %c0_i32 = arith.constant 0 : i32
    %2 = arith.minsi %1, %c0_i32 : i32
    %c0_i32_0 = arith.constant 0 : i32
    %c0_i32_1 = arith.constant 0 : i32
    return %2, %c0_i32_0 : i32, i32
  }
  func.func @transform_2(%arg0: i32, %arg1: i32) -> (i32, i32, i32) {
    %c0_i32 = arith.constant 0 : i32
    %c0_i32_0 = arith.constant 0 : i32
    %c0_i32_1 = arith.constant 0 : i32
    return %arg0, %c0_i32, %c0_i32_0 : i32, i32, i32
  }
}

</mosaic_0001>

<bundles_post_ra>
// kernel: tpu_custom_call.1
= control target key start
LH: loop header
LB: loop body
LE: loop exit
PB: predicated region body
PF: predicated region fallthrough
CT: control target
= control target key end

     0   :  { %7 = vsyncpa [#allocation4], 0  ;;  %s231_s0 = inlined_call_operand.hbm [shape: f32[16,128], index: 0, kind: input, shape index: {}]   ;;  %s232_s1 = inlined_call_operand.hbm [shape: f32[16,128], index: 1, kind: input, shape index: {}]   ;;  %s233_s2 = inlined_call_operand.hbm [shape: f32[1,1,128], index: 2, kind: output, shape index: {}]  }
   0x1   :  { %8 = vsyncpa [#allocation7], 0 }
   0x2   :  { %9 = vsyncpa [#allocation5], 0  ;;  %s20_s11 = sshll.u32 %s231_s0, 4  ;;  %s202_s12 = smov [#allocation3]   ;;  %s21_s11 = int_to_ptr.hbm [resolvable:$true] %s20_s11 }
   0x3   :  { %s22_s13 = sshll.u32 %s202_s12, 4  ;;  %s39_s16 = sshll.u32 %s232_s1, 4  ;;  %s23_s13 = int_to_ptr.vmem [resolvable:$true] %s22_s13  ;;  %s40_s16 = int_to_ptr.hbm [resolvable:$true] %s39_s16 }
   0x4   :  { %s203_s17 = smov 128   ;;  %s204_s18 = smov 8  }
   0x5   :  { %28 = dma.hbm_to_vmem [thread:$0]  %s21_s11, 256, %s23_s13, [#allocation4], %s203_s17, %s203_s17, %s204_s18  }
   0x6   :  { %s205_s19 = smov [#allocation6]  }
   0x7   :  { %s41_s20 = sshll.u32 %s205_s19, 4  ;;  %s42_s20 = int_to_ptr.vmem [resolvable:$true] %s41_s20 }
   0x8   :  { %47 = dma.hbm_to_vmem [thread:$0]  %s40_s16, 256, %s42_s20, [#allocation7], %s203_s17, %s203_s17, %s204_s18  }
   0x9   :  { %196 = dma.done.wait [#allocation4], 256  }
   0xa   :  { %197 = vsyncadd [#allocation4], 4294967040 }
   0xb   :  { %198 = dma.done.wait [#allocation7], 256  }
   0xc   :  { %199 = vsyncadd [#allocation7], 4294967040  ;;  %v70_v0 = vld [vmem:[#allocation3] sm:$0xff]  ;;  %v71_v1 = vld [vmem:[#allocation3 + $0x8] sm:$0xff]  ;;  %s206_s0 = smov [#allocation8]   ;;  %s104_s23 = sshll.u32 %s233_s2, 4  ;;  %s105_s23 = int_to_ptr.hbm [resolvable:$true] %s104_s23 }
   0xd   :  { %v72_v2 = vld [vmem:[#allocation6] sm:$0xff]  ;;  %v73_v3 = vld [vmem:[#allocation6 + $0x8] sm:$0xff]  ;;  %s102_s1 = sshll.u32 %s206_s0, 4  ;;  %s103_s1 = int_to_ptr.vmem [resolvable:$true] %s102_s1 }
   0xe   :  { %v74_v4 = vsub.f32 %v70_v0, %v72_v2  ;;  %v75_v5 = vsub.f32 %v71_v1, %v73_v3 }
  0x10   :  { %v76_v6 = vmul.f32 %v74_v4, %v74_v4  ;;  %v77_v7 = vmul.f32 %v75_v5, %v75_v5 }
  0x12   :  { %v89_v8 = vadd.f32 %v77_v7, %v76_v6 }
  0x14   :  { %v90_v9 = vrot.slane %v89_v8, 4 }
  0x16   :  { %v91_v10 = vadd.f32 %v90_v9, %v89_v8 }
  0x18   :  { %v92_v11 = vrot.slane %v91_v10, 2 }
  0x1a   :  { %v93_v12 = vadd.f32 %v92_v11, %v91_v10 }
  0x1c   :  { %v94_v13 = vrot.slane %v93_v12, 1 }
  0x1e   :  { %v95_v14 = vadd.f32 %v94_v13, %v93_v12 }
  0x20   :  { %96 = vst [vmem:[#allocation8] sm:$0x1] %v95_v14 }
  0x21   :  { %107 = dma.vmem_to_hbm [thread:$0]  %s103_s1, 16, %s105_s23, [#allocation5]  }
  0x22   :  { %200 = dma.done.wait [#allocation5], 16  }
  0x23   :  { %201 = vsyncadd [#allocation5], 4294967280 }
  0x24   :  { %112 = vsyncpa [#allocation4], 1 }
  0x25   :  { %113 = vsyncpa [#allocation7], 1 }
  0x26   :  { %114 = vsyncpa [#allocation5], 1 }

</bundles_post_ra>
